<compile_context>
chip_gen: v7x
topology: tpu7x:2x2x1
jax: 0.10.0
libtpu: 0.0.40
codegen_flags: <defaults>
</compile_context>

<pallas_src>
import jax
import jax.numpy as jnp
from jax.experimental import pallas as pl
from jax.experimental.pallas import tpu as pltpu


def _sdb2_kernel(x_ref, w1t_ref, w2t_ref, b_ref, o_ref, xh_ref):
    # x_ref  : (bt, L, C)        unpadded input block
    # w1t_ref: (C, C)            W.T / pool_size   (first linear, scale folded in)
    # w2t_ref: (C, C)            W.T               (second use of the shared linear)
    # b_ref  : (1, C)            bias (f32)
    # o_ref  : (bt, L, C)        output block
    # xh_ref : (bt, L + 2p, C)   halo-padded VMEM scratch
    bt, l, c = x_ref.shape
    l_halo = xh_ref.shape[1]
    pool = l_halo - l + 1
    p = (pool - 1) // 2

    # Build the zero halo in the scratch.  Only the 2*p halo rows are zeroed,
    # and they are zeroed every step (no reliance on program_id==0 init, which
    # would break under megacore grid sharding); the data rows are overwritten
    # with this step's block.
    if p:
        zrows = jnp.zeros((bt, p, c), xh_ref.dtype)
        xh_ref[:, 0:p, :] = zrows
        xh_ref[:, p + l:l_halo, :] = zrows
    x = x_ref[...]
    xh_ref[:, p:p + l, :] = x

    # AvgPool1d(pool, stride=1, count_include_pad=True): `pool` shifted adds on
    # the VPU, read directly from the scratch ref to keep the live set small.
    # The 1/pool scale is pre-folded into w1t.
    acc = xh_ref[:, 0:l, :].astype(jnp.float32)
    for k in range(1, pool):
        acc = acc + xh_ref[:, k:k + l, :].astype(jnp.float32)

    w1 = w1t_ref[...]
    w2 = w2t_ref[...]
    b = b_ref[...]

    # Fold (bt, L) into the matmul M dimension so both linears run as one
    # large 2-D MXU matmul per grid step (f32 accumulation).
    pooled_2d = acc.reshape(bt * l, c).astype(w1.dtype)
    h = jnp.dot(pooled_2d, w1, preferred_element_type=jnp.float32) + b
    h = jnp.maximum(h, 0.0)
    g = jax.nn.sigmoid(
        jnp.dot(h.astype(w2.dtype), w2, preferred_element_type=jnp.float32) + b)

    o_ref[...] = (x.astype(jnp.float32) * g.reshape(bt, l, c)).astype(o_ref.dtype)


def _round_up(v, m):
    return ((v + m - 1) // m) * m


def _vmem_budget_bytes():
    """Generation-aware VMEM budget (also used as the scoped-vmem limit)."""
    try:
        cap = int(pltpu.get_tpu_info().vmem_capacity_bytes)
    except Exception:  # not on TPU / query unavailable: assume v7x per-core 64 MiB
        cap = 64 * 1024 * 1024
    # ~60% of capacity, capped: ~76 MiB on v5e/v6e (128 MiB VMEM), ~38 MiB on
    # v7x (64 MiB per TensorCore); leaves headroom for compiler scratch.
    return max(32 * 1024 * 1024, min(int(cap * 0.6), 96 * 1024 * 1024))


def _pick_block_b(n, l, l_halo, c, in_itemsize, out_itemsize, mm_itemsize,
                  vmem_budget):
    """Batch elements per grid step.

    Largest bt whose (double-buffered) tiles + f32 temporaries fit the VMEM
    budget, rebalanced so the grid-step count is even where possible (v7x
    shards the "parallel" batch axis across 2 TensorCores).  bt need NOT divide
    N: the grid uses cdiv and the last block may be ragged.
    """
    c_pad = _round_up(c, 128)       # lane padding imposed by the VMEM layout
    l_pad = _round_up(l, 8)         # sublane padding
    lh_pad = _round_up(l_halo, 8)

    def vmem_use(bt):
        use = 2 * bt * l_pad * c_pad * in_itemsize          # x block (double-buffered)
        use += 2 * bt * l_pad * c_pad * out_itemsize        # out block (double-buffered)
        use += bt * lh_pad * c_pad * in_itemsize            # halo scratch (single)
        use += 6 * bt * l_pad * c_pad * 4                   # f32 temporaries (acc/h/g/x)
        use += 2 * (2 * c_pad * c_pad + c_pad) * max(mm_itemsize, 4)  # W1, W2, bias
        return use

    bt_max = 1
    for bt in range(1, n + 1):
        if vmem_use(bt) <= vmem_budget:
            bt_max = bt
        else:
            break

    if bt_max >= n:
        # Whole batch fits one block; still split in two so a dual-TensorCore
        # chip gets parallel work along the "parallel" grid axis.
        return n if n == 1 else -(-n // 2)

    steps = -(-n // bt_max)
    bt = -(-n // steps)                      # rebalance block sizes
    if steps % 2 and steps > 1:
        bt = -(-n // (steps + 1))            # prefer an even step count (v7x)
    return max(bt, 1)


def spatial_dynamic_block2(x, weight, bias, pool_size, *, matmul_in_bf16=None):
    """x: (N, L, C); weight: (C, C) torch Linear layout (out, in); bias: (C,)."""
    N, L, C = x.shape
    if pool_size % 2 != 1:
        raise NotImplementedError(
            "pool_size must be odd: for even pool_size the torch module itself "
            "produces length L-1 and the final elementwise multiply fails.")
    if weight.shape != (C, C) or bias.shape != (C,):
        raise ValueError("shared Linear must map C -> C (hidden_dim == channels)")

    p = (pool_size - 1) // 2
    l_halo = L + 2 * p

    if matmul_in_bf16 is None:
        matmul_in_bf16 = x.dtype == jnp.bfloat16
    mm_dtype = jnp.bfloat16 if matmul_in_bf16 else jnp.float32

    # Tiny, grid-invariant operands (no per-element HBM pass over x).
    w1t = (weight.T.astype(jnp.float32) / pool_size).astype(mm_dtype)  # 1/pool folded
    w2t = weight.T.astype(mm_dtype)
    b2 = bias.astype(jnp.float32).reshape(1, C)

    vmem_budget = _vmem_budget_bytes()
    bt = _pick_block_b(N, L, l_halo, C, x.dtype.itemsize, x.dtype.itemsize,
                       jnp.dtype(mm_dtype).itemsize, vmem_budget)
    steps = pl.cdiv(N, bt)

    cost = pl.CostEstimate(
        flops=int(4 * N * L * C * C + (pool_size + 4) * N * L * C),
        transcendentals=int(N * L * C),
        bytes_accessed=int(2 * N * L * C * x.dtype.itemsize
                           + 2 * C * C * jnp.dtype(mm_dtype).itemsize + C * 4),
    )

    return pl.pallas_call(
        _sdb2_kernel,
        out_shape=jax.ShapeDtypeStruct((N, L, C), x.dtype),
        grid_spec=pltpu.PrefetchScalarGridSpec(
            num_scalar_prefetch=0,
            grid=(steps,),
            in_specs=[
                pl.BlockSpec((bt, L, C), lambda n: (n, 0, 0)),
                pl.BlockSpec((C, C), lambda n: (0, 0)),
                pl.BlockSpec((C, C), lambda n: (0, 0)),
                pl.BlockSpec((1, C), lambda n: (0, 0)),
            ],
            out_specs=pl.BlockSpec((bt, L, C), lambda n: (n, 0, 0)),
            scratch_shapes=[pltpu.VMEM((bt, l_halo, C), x.dtype)],
        ),
        compiler_params=pltpu.CompilerParams(
            dimension_semantics=("parallel",),
            vmem_limit_bytes=vmem_budget,
        ),
        cost_estimate=cost,
    )(x, w1t, w2t, b2)


def _reference(x, weight, bias, pool_size):
    """Plain-JAX reference mirroring the PyTorch forward."""
    N, L, C = x.shape
    p = (pool_size - 1) // 2
    xp = jnp.pad(x.astype(jnp.float32), ((0, 0), (p, p), (0, 0)))
    pooled = sum(xp[:, k:k + L, :] for k in range(pool_size)) / pool_size
    wt = weight.T.astype(jnp.float32)
    b = bias.astype(jnp.float32)
    h = jnp.maximum(pooled @ wt + b, 0.0)
    g = jax.nn.sigmoid(h @ wt + b)
    return (x.astype(jnp.float32) * g).astype(x.dtype)


if __name__ == "__main__":
    key = jax.random.PRNGKey(0)

    def _run_case(case_key, N, L, C, pool_size):
        kx, kw, kb = jax.random.split(case_key, 3)
        x = jax.random.normal(kx, (N, L, C), dtype=jnp.float32)
        bound = 1.0 / (C ** 0.5)   # torch.nn.Linear default init range
        weight = jax.random.uniform(kw, (C, C), jnp.float32, -bound, bound)
        bias = jax.random.uniform(kb, (C,), jnp.float32, -bound, bound)

        out = jax.block_until_ready(spatial_dynamic_block2(x, weight, bias, pool_size))
        ref = _reference(x, weight, bias, pool_size)
        assert out.shape == (N, L, C)
        assert jnp.allclose(out, ref, atol=1e-5, rtol=1e-5), "mismatch vs reference"

    k1, k2, k3 = jax.random.split(key, 3)
    # batch=2, seq=16, channels=hidden_dim=32 (the shared LazyLinear is C -> C)
    _run_case(k1, N=2, L=16, C=32, pool_size=3)
    # larger batch exercises multi-batch blocking (bt > 1, folded matmul M dim)
    _run_case(k2, N=8, L=16, C=32, pool_size=5)
    # awkward batch + non-128 channels: ragged last block (grid=cdiv) and
    # unpadded lane dimension, both handled in-kernel
    _run_case(k3, N=5, L=16, C=48, pool_size=3)
    print("KERNEL_OK")
</pallas_src>

<mosaic_0001>
module attributes {stable_mosaic.version = 11 : i64} {
  func.func @_sdb2_kernel(%arg0: i32, %arg1: memref<1x16x32xf32, #tpu.memory_space<vmem>>, %arg2: memref<32x32xf32, #tpu.memory_space<vmem>>, %arg3: memref<32x32xf32, #tpu.memory_space<vmem>>, %arg4: memref<1x32xf32, #tpu.memory_space<vmem>>, %arg5: memref<1x16x32xf32, #tpu.memory_space<vmem>>, %arg6: memref<1x18x32xf32, #tpu.memory_space<vmem>>) attributes {dimension_semantics = [#tpu.dimension_semantics<parallel>], iteration_bounds = array<i64: 2>, scalar_prefetch = 0 : i64, scratch_operands = 1 : i64, tpu.core_type = #tpu.core_type<tc>, window_params = [{transform_indices = @transform_0, window_bounds = array<i64: 1, 16, 32>}, {pipeline_mode = #tpu.pipeline_mode<synchronous>, transform_indices = @transform_1, window_bounds = array<i64: 32, 32>}, {pipeline_mode = #tpu.pipeline_mode<synchronous>, transform_indices = @transform_2, window_bounds = array<i64: 32, 32>}, {pipeline_mode = #tpu.pipeline_mode<synchronous>, transform_indices = @transform_3, window_bounds = array<i64: 1, 32>}, {transform_indices = @transform_4, window_bounds = array<i64: 1, 16, 32>}]} {
    %cst = arith.constant 0.000000e+00 : f32
    %0 = vector.broadcast %cst : f32 to vector<1x1x32xf32>
    %c0 = arith.constant 0 : index
    %c0_0 = arith.constant 0 : index
    %c0_1 = arith.constant 0 : index
    %1 = vector.load %arg6[%c0, %c0_0, %c0_1] : memref<1x18x32xf32, #tpu.memory_space<vmem>>, vector<1x1x32xf32>
    tpu.vector_store %arg6[%c0, %c0_0, %c0_1], %0 {strides = array<i32>} : memref<1x18x32xf32, #tpu.memory_space<vmem>>, vector<1x1x32xf32>,
    %c0_2 = arith.constant 0 : index
    %c17 = arith.constant 17 : index
    %c0_3 = arith.constant 0 : index
    %2 = vector.load %arg6[%c0_2, %c17, %c0_3] : memref<1x18x32xf32, #tpu.memory_space<vmem>>, vector<1x1x32xf32>
    tpu.vector_store %arg6[%c0_2, %c17, %c0_3], %0 {strides = array<i32>} : memref<1x18x32xf32, #tpu.memory_space<vmem>>, vector<1x1x32xf32>,
    %c0_4 = arith.constant 0 : index
    %c0_5 = arith.constant 0 : index
    %c0_6 = arith.constant 0 : index
    %3 = vector.load %arg1[%c0_4, %c0_5, %c0_6] : memref<1x16x32xf32, #tpu.memory_space<vmem>>, vector<1x16x32xf32>
    %c0_7 = arith.constant 0 : index
    %c1 = arith.constant 1 : index
    %c0_8 = arith.constant 0 : index
    %4 = vector.load %arg6[%c0_7, %c1, %c0_8] : memref<1x18x32xf32, #tpu.memory_space<vmem>>, vector<1x16x32xf32>
    tpu.vector_store %arg6[%c0_7, %c1, %c0_8], %3 {strides = array<i32>} : memref<1x18x32xf32, #tpu.memory_space<vmem>>, vector<1x16x32xf32>,
    %c0_9 = arith.constant 0 : index
    %c0_10 = arith.constant 0 : index
    %c0_11 = arith.constant 0 : index
    %5 = vector.load %arg6[%c0_9, %c0_10, %c0_11] : memref<1x18x32xf32, #tpu.memory_space<vmem>>, vector<1x16x32xf32>
    %c0_12 = arith.constant 0 : index
    %c1_13 = arith.constant 1 : index
    %c0_14 = arith.constant 0 : index
    %6 = vector.load %arg6[%c0_12, %c1_13, %c0_14] : memref<1x18x32xf32, #tpu.memory_space<vmem>>, vector<1x16x32xf32>
    %7 = arith.addf %5, %6 : vector<1x16x32xf32>
    %c0_15 = arith.constant 0 : index
    %c2 = arith.constant 2 : index
    %c0_16 = arith.constant 0 : index
    %8 = vector.load %arg6[%c0_15, %c2, %c0_16] : memref<1x18x32xf32, #tpu.memory_space<vmem>>, vector<1x16x32xf32>
    %9 = arith.addf %7, %8 : vector<1x16x32xf32>
    %c0_17 = arith.constant 0 : index
    %c0_18 = arith.constant 0 : index
    %10 = vector.load %arg2[%c0_17, %c0_18] : memref<32x32xf32, #tpu.memory_space<vmem>>, vector<32x32xf32>
    %c0_19 = arith.constant 0 : index
    %c0_20 = arith.constant 0 : index
    %11 = vector.load %arg3[%c0_19, %c0_20] : memref<32x32xf32, #tpu.memory_space<vmem>>, vector<32x32xf32>
    %c0_21 = arith.constant 0 : index
    %c0_22 = arith.constant 0 : index
    %12 = vector.load %arg4[%c0_21, %c0_22] : memref<1x32xf32, #tpu.memory_space<vmem>>, vector<1x32xf32>
    %13 = vector.shape_cast %9 : vector<1x16x32xf32> to vector<16x32xf32>
    %cst_23 = arith.constant dense<0.000000e+00> : vector<16x32xf32>
    %14 = tpu.matmul %13, %10, %cst_23 {dimension_numbers = #tpu.dot_dimension_numbers<[1], [0], [0], [1], [0, 0, 1, 1], [], []>} : vector<16x32xf32>, vector<32x32xf32>, vector<16x32xf32> -> vector<16x32xf32>
    %15 = vector.broadcast %12 : vector<1x32xf32> to vector<16x32xf32>
    %16 = arith.addf %14, %15 : vector<16x32xf32>
    %cst_24 = arith.constant 0.000000e+00 : f32
    %17 = vector.broadcast %cst_24 : f32 to vector<16x32xf32>
    %18 = arith.maximumf %16, %17 : vector<16x32xf32>
    %cst_25 = arith.constant dense<0.000000e+00> : vector<16x32xf32>
    %19 = tpu.matmul %18, %11, %cst_25 {dimension_numbers = #tpu.dot_dimension_numbers<[1], [0], [0], [1], [0, 0, 1, 1], [], []>} : vector<16x32xf32>, vector<32x32xf32>, vector<16x32xf32> -> vector<16x32xf32>
    %20 = vector.broadcast %12 : vector<1x32xf32> to vector<16x32xf32>
    %21 = arith.addf %19, %20 : vector<16x32xf32>
    %22 = arith.negf %21 : vector<16x32xf32>
    %23 = math.exp %22 : vector<16x32xf32>
    %cst_26 = arith.constant 1.000000e+00 : f32
    %24 = vector.broadcast %cst_26 : f32 to vector<16x32xf32>
    %25 = arith.addf %24, %23 : vector<16x32xf32>
    %26 = arith.divf %24, %25 : vector<16x32xf32>
    %27 = vector.shape_cast %26 : vector<16x32xf32> to vector<1x16x32xf32>
    %28 = arith.mulf %3, %27 : vector<1x16x32xf32>
    %c0_27 = arith.constant 0 : index
    %c0_28 = arith.constant 0 : index
    %c0_29 = arith.constant 0 : index
    %29 = vector.load %arg5[%c0_27, %c0_28, %c0_29] : memref<1x16x32xf32, #tpu.memory_space<vmem>>, vector<1x16x32xf32>
    tpu.vector_store %arg5[%c0_27, %c0_28, %c0_29], %28 {strides = array<i32>} : memref<1x16x32xf32, #tpu.memory_space<vmem>>, vector<1x16x32xf32>,
    return
  }
  func.func @transform_0(%arg0: i32) -> (i32, i32, i32) {
    %c0_i32 = arith.constant 0 : i32
    %c0_i32_0 = arith.constant 0 : i32
    %c0_i32_1 = arith.constant 0 : i32
    return %arg0, %c0_i32, %c0_i32_0 : i32, i32, i32
  }
  func.func @transform_1(%arg0: i32) -> (i32, i32) {
    %c0_i32 = arith.constant 0 : i32
    %c0_i32_0 = arith.constant 0 : i32
    %c0_i32_1 = arith.constant 0 : i32
    return %c0_i32, %c0_i32_0 : i32, i32
  }
  func.func @transform_2(%arg0: i32) -> (i32, i32) {
    %c0_i32 = arith.constant 0 : i32
    %c0_i32_0 = arith.constant 0 : i32
    %c0_i32_1 = arith.constant 0 : i32
    return %c0_i32, %c0_i32_0 : i32, i32
  }
  func.func @transform_3(%arg0: i32) -> (i32, i32) {
    %c0_i32 = arith.constant 0 : i32
    %c0_i32_0 = arith.constant 0 : i32
    %c0_i32_1 = arith.constant 0 : i32
    return %c0_i32, %c0_i32_0 : i32, i32
  }
  func.func @transform_4(%arg0: i32) -> (i32, i32, i32) {
    %c0_i32 = arith.constant 0 : i32
    %c0_i32_0 = arith.constant 0 : i32
    %c0_i32_1 = arith.constant 0 : i32
    return %arg0, %c0_i32, %c0_i32_0 : i32, i32, i32
  }
}

</mosaic_0001>

<bundles_post_ra>
// kernel: tpu_custom_call.1
= control target key start
LH: loop header
LB: loop body
LE: loop exit
PB: predicated region body
PF: predicated region fallthrough
CT: control target
= control target key end

     0   :  { %9 = vsyncpa [#allocation4], 0  ;;  %s1171_s0 = inlined_call_operand.hbm [shape: f32[2,16,32], index: 0, kind: input, shape index: {}]   ;;  %s1172_s1 = inlined_call_operand.hbm [shape: f32[32,32], index: 1, kind: input, shape index: {}]   ;;  %s1173_s2 = inlined_call_operand.hbm [shape: f32[32,32], index: 2, kind: input, shape index: {}]   ;;  %s1174_s3 = inlined_call_operand.vmem [shape: f32[1,32], index: 3, kind: input, shape index: {}]   ;;  %s1175_s4 = inlined_call_operand.hbm [shape: f32[2,16,32], index: 4, kind: output, shape index: {}]  }
   0x1   :  { %11 = vsyncpa [#allocation4 + $0x1], 0 }
   0x2   :  { %12 = vsyncpa [#allocation7], 0 }
   0x3   :  { %13 = vsyncpa [#allocation5], 0 }
   0x4   :  { %15 = vsyncpa [#allocation5 + $0x1], 0  ;;  %s913_s15 = smov 0   ;;  %s915_s16 = smov 0  }
   0x5   :  { %s917_s17 = smov 0   ;;  %s919_s18 = smov 0  }
   0x6 LB: > { %s934_s19 = sadd.s32 4294967295, %s877_s18   ;;  %s564_s20 = sadd.s32 4294967294, %s877_s18   ;;  %s877_s18 = sphi %s919_s18, %s1195_s18   ;;  %s873_s17 = sphi %s917_s17, %s1194_s17   ;;  %s869_s16 = sphi %s915_s16, %s1193_s16   ;;  %s865_s15 = sphi %s913_s15, %s1192_s15  }
   0x7   : > { %p41_p0 = scmp.ne.s32.totalorder %s869_s16, %s865_s15  ;;  %p1176_p1 = scmp.eq.s32.totalorder %s934_s19, 0 }
   0x8   : > { %p134_p3 = scmp.eq.s32.totalorder %s564_s20, 1  ;;  %p565_p5 = scmp.ge.s32.totalorder %s877_s18, 1 }
   0x9   : > { %p943_p4 = por %p1176_p1, %p41_p0  ;;  %p141_p7 = scmp.lt.s32.totalorder %s877_s18, 3 }
   0xa   : > { %p948_p6 = por %p134_p3, %p41_p0  ;;  %s879_s24 = smov [#allocation6]  }
   0xb   : > { %s1179_s21 = scalar_select %p943_p4, 1, 0 }
   0xc   : > { %s1180_s22 = scalar_select %p948_p6, 1, 0 }
   0xd   : > { %p953_p8 = pnand %p565_p5, %p141_p7  ;;  %s153_s25 = sshll.u32 %s879_s24, 4  ;;  %s957_s25 = int_to_ptr.vmem [resolvable:$true] %s153_s25 }
   0xe   : > { %s880_s27 = smov [#allocation8]   ;;  %s721_s5 = scalar_lea.hbm %s1172_s1, 512 }
   0xf   : > { %p653_p9 = pneg %p953_p8  ;;  %s166_s28 = sshll.u32 %s880_s27, 4  ;;  %s968_s28 = int_to_ptr.vmem [resolvable:$true] %s166_s28 }
  0x10   : > { %p722_p12 = scmp.ne.s32.totalorder %s1172_s1, %s721_s5  ;;  %p728_p5 = scmp.lt.u32.totalorder %s721_s5, %s1172_s1 }
  0x11   : > { %p964_p11 = pnand %p653_p9, %p1176_p1 }
  0x13   : > { %p723_p13 = pneg %p964_p11 }
  0x15   : > { %p724_p0 = pnand %p723_p13, %p722_p12 }
  0x17   : > { %p725_p3 = pneg %p724_p0 }
  0x19   : > { %p730_p7 = pnand %p728_p5, %p725_p3 }
  0x1b   : > { %733 = shalt.err (!%p730_p7)
}
  0x1c   : > { %s734_s10 = scalar_lea.vmem %s957_s25, 512  ;;  %p742_p2 = scmp.lt.s32.totalorder %s957_s25, %s957_s25 }
  0x1d   : > { %p735_p9 = scmp.ne.s32.totalorder %s957_s25, %s734_s10  ;;  %p743_p12 = scmp.lt.s32.totalorder %s734_s10, %s734_s10 }
  0x1f   : > { %p737_p10 = pnand %p735_p9, %p723_p13  ;;  %p744_p0 = por %p743_p12, %p742_p2 }
  0x21   : > { %p738_p1 = pneg %p737_p10 }
  0x23   : > { %p745_p6 = pnand %p744_p0, %p738_p1 }
  0x25   : > { %748 = shalt.err (!%p745_p6)
}
  0x26   : > { %s881_s11 = smov 128   ;;  %s882_s12 = smov 8  }
  0x27   : > { %656 = dma.hbm_to_vmem [thread:$0]  (!%p964_p11), %s1172_s1, 512, %s957_s25, [#allocation7], %s881_s11, %s881_s11, %s882_s12  }
  0x28   : > { %s749_s27 = scalar_lea.hbm %s1173_s2, 512 }
  0x29   : > { %p750_p1 = scmp.ne.s32.totalorder %s1173_s2, %s749_s27  ;;  %p756_p10 = scmp.lt.u32.totalorder %s749_s27, %s1173_s2 }
  0x2b   : > { %p752_p2 = pnand %p750_p1, %p723_p13 }
  0x2d   : > { %p753_p6 = pneg %p752_p2 }
  0x2f   : > { %p758_p3 = pnand %p756_p10, %p753_p6 }
  0x31   : > { %761 = shalt.err (!%p758_p3)
}
  0x32   : > { %s762_s25 = scalar_lea.vmem %s968_s28, 512  ;;  %p770_p12 = scmp.lt.s32.totalorder %s968_s28, %s968_s28 }
  0x33   : > { %p763_p5 = scmp.ne.s32.totalorder %s968_s28, %s762_s25  ;;  %p771_p0 = scmp.lt.s32.totalorder %s762_s25, %s762_s25 }
  0x35   : > { %p765_p7 = pnand %p763_p5, %p723_p13  ;;  %p772_p1 = por %p771_p0, %p770_p12 }
  0x37   : > { %p766_p9 = pneg %p765_p7 }
  0x39   : > { %p773_p2 = pnand %p772_p1, %p766_p9 }
  0x3b   : > { %776 = shalt.err (!%p773_p2)
}
  0x3c   : > { %659 = dma.hbm_to_vmem [thread:$0]  (!%p964_p11), %s1173_s2, 512, %s968_s28, [#allocation7], %s881_s11, %s881_s11, %s882_s12  }
  0x3d   : > { %s1029_s26 = sadd.s32 1, %s877_s18   ;;  %s28_s9 = sadd.s32 1, %s873_s17 }
  0x3e   : > { %s25_s10 = ssub.s32 %s877_s18, %s1029_s26  ;;  %p35_p13 = scmp.ne.s32.totalorder %s873_s17, %s869_s16 }
  0x3f   : > { %p26_p6 = scmp.eq.s32.totalorder %s25_s10, 0  ;;  %p36_p10 = scmp.eq.s32.totalorder %s877_s18, 0 }
  0x40   : > { %p1183_p3 = scmp.eq.s32.totalorder %s934_s19, 1  ;;  %p670_p7 = scmp.lt.s32.totalorder %s877_s18, 2 }
  0x41   : > { %s1045_s14 = scalar_select %p26_p6, %s873_s17, %s28_s9  }
  0x42   : > { %p1039_p5 = por %p1183_p3, %p35_p13  ;;  %p37_p9 = por %p36_p10, %p35_p13 }
  0x43   : > { %s183_s20 = sand.u32 1, %s873_s17   ;;  %s589_s28 = sshll.u32 %s877_s18, 8 }
  0x44   : > { %s1184_s13 = scalar_select %p1039_p5, 1, 0 }
  0x45   : > { %s569_s24 = sshll.u32 %s183_s20, 4  ;;  %s1052_s30 = scalar_lea.hbm %s1171_s0, %s589_s28 }
  0x46   : > { %s187_s5 = scalar_lea.vmem [#allocation3], %s569_s24  ;;  %p1056_p11 = pnand %p670_p7, %p37_p9 }
  0x47   : > { %s194_s6 = sshll.u32 %s187_s5, 4  ;;  %s1060_s7 = scalar_lea.sflag [#allocation4], %s183_s20  ;;  %s1054_s6 = int_to_ptr.vmem [resolvable:$true] %s194_s6 }
  0x48   : > { %s777_s8 = scalar_lea.hbm %s1052_s30, 256  ;;  %p779_p0 = pneg %p1056_p11 }
  0x49   : > { %p778_p12 = scmp.ne.s32.totalorder %s1052_s30, %s777_s8  ;;  %s782_s24 = scalar_lea.hbm %s1171_s0, 512 }
  0x4a   : > { %p783_p13 = scmp.lt.u32.totalorder %s1052_s30, %s1171_s0  ;;  %p784_p6 = scmp.lt.u32.totalorder %s782_s24, %s777_s8 }
  0x4b   : > { %p780_p1 = pnand %p779_p0, %p778_p12  ;;  %p786_p3 = scmp.lt.u32.totalorder %s777_s8, %s1052_s30 }
  0x4c   : > { %p785_p10 = por %p784_p6, %p783_p13 }
  0x4d   : > { %p781_p2 = pneg %p780_p1 }
  0x4e   : > { %p787_p7 = por %p786_p3, %p785_p10 }
  0x50   : > { %p788_p9 = pnand %p787_p7, %p781_p2 }
  0x52   : > { %791 = shalt.err (!%p788_p9)
}
  0x53   : > { %s792_s20 = scalar_lea.vmem %s1054_s6, 256  ;;  %s883_s29 = smov [#allocation3]  }
  0x54   : > { %p793_p12 = scmp.ne.s32.totalorder %s1054_s6, %s792_s20  ;;  %s797_s5 = sshll.u32 %s883_s29, 4  ;;  %s798_s5 = int_to_ptr.vmem [resolvable:$false] %s797_s5 }
  0x55   : > { %s799_s9 = scalar_lea.vmem %s798_s5, 512  ;;  %p800_p4 = scmp.lt.s32.totalorder %s1054_s6, %s798_s5 }
  0x56   : > { %p795_p1 = pnand %p793_p12, %p779_p0  ;;  %p801_p13 = scmp.lt.s32.totalorder %s799_s9, %s792_s20 }
  0x58   : > { %p796_p5 = pneg %p795_p1  ;;  %p802_p6 = por %p801_p13, %p800_p4 }
  0x5a   : > { %p803_p10 = pnand %p802_p6, %p796_p5 }
  0x5c   : > { %806 = shalt.err (!%p803_p10)
}
  0x5d   : > { %663 = dma.hbm_to_vmem [thread:$0]  (!%p1056_p11), %s1052_s30, 256, %s1054_s6, %s1060_s7, %s881_s11, %s881_s11, %s882_s12  }
  0x5e   : > { %206 = sbr.rel (%p953_p8) target bundleno = 598 (0x256), region = 36  ;;  %s1094_s8 = sand.u32 (!%p953_p8), 1, %s869_s16  }
  0x5f   : > { %s573_s10 = sshll.u32 (!%p953_p8), %s1094_s8, 4  ;;  %s209_s24 = scalar_lea.sflag (!%p953_p8), [#allocation4], %s1094_s8 }
  0x60   : > { %s212_s25 = scalar_lea.vmem (!%p953_p8), [#allocation3], %s573_s10  ;;  %p1186_p4 = scmp.ne.s32.totalorder (!%p953_p8), %s1179_s21, 0 }
  0x65   : > { %852 = dma.done.wait (%p1186_p4), %s209_s24, 256  }
  0x66   : > { %854 = vsyncadd (%p1186_p4), %s209_s24, 4294967040  ;;  %p1187_p5 = scmp.eq.s32.totalorder %s934_s19, 0 }
  0x68   : > { %856 = dma.done.wait (%p1187_p5), [#allocation7], 1024   ;;  %p1188_p8 = pmov %p1187_p5 }
  0x69   : > { %vm245_vm0 = vcmask 253952   ;;  %v884_v0 = vmov 0.0   ;;  %vm250_vm1 = vcmask 261120   ;;  %v263_v1 = vld [vmem:[#allocation6] sm:$0xff]  ;;  %v264_v2 = vld [vmem:[#allocation6 + $0x8] sm:$0xff]  ;;  %v265_v3 = vld [vmem:[#allocation6 + $0x10] sm:$0xff] }
  0x6a   : > { %858 = vsyncadd (%p1188_p8), [#allocation7], 4294966272  ;;  %246 = vst.msk [vmem:[#allocation2] sm:$0x1] %vm245_vm0, %v884_v0  ;;  %v625_v4 = vpack.c.bf16 %v264_v2, %v263_v1  ;;  %v266_v5 = vld [vmem:[#allocation6 + $0x18] sm:$0xff]  ;;  %v248_v6 = vld [vmem:[%s212_s25] sm:$0xff] }
  0x6b   : > { %247 = vst.msk [vmem:[#allocation2 + $0x11] sm:$0x1] %vm245_vm0, %v884_v0  ;;  %v249_v7 = vld [vmem:[%s212_s25 + $0x8] sm:$0xff]  ;;  %v629_v8 = vpack.c.bf16 %v266_v5, %v265_v3  ;;  %v267_v9 = vld [vmem:[#allocation8] sm:$0xff]  ;;  %v269_v22 = vld [vmem:[#allocation8 + $0x10] sm:$0xff]  ;;  %s590_s11 = sshll.u32 %s934_s19, 8 }
  0x6c   : > { %251 = vst.msk [vmem:[#allocation2 + $0x1] sm:$0xff] %vm250_vm1, %v248_v6  ;;  %252 = vst.msk [vmem:[#allocation2 + $0x9] sm:$0xff] %vm250_vm1, %v249_v7  ;;  %v268_v10 = vld [vmem:[#allocation8 + $0x8] sm:$0xff]  ;;  %626 = vmatprep.subr.bf16.mxu0 %v625_v4  ;;  %v270_v23 = vld [vmem:[#allocation8 + $0x18] sm:$0xff]  ;;  %s244_s12 = scalar_lea.vmem [#allocation9], %s573_s10  ;;  %s1123_s28 = scalar_lea.hbm %s1175_s4, %s590_s11 }
  0x6d   : > { %v633_v11 = vpack.c.bf16 %v268_v10, %v267_v9  ;;  %628 = vmatpush3.bf16.msra.mxu0 %v625_v4  ;;  %v637_v24 = vpack.c.bf16 %v270_v23, %v269_v22  ;;  %v577_v25 = vld [vmem:[%s1174_s3] ss:$0 sm:$0xff]  ;;  %s472_s30 = sshll.u32 %s244_s12, 4  ;;  %s459_s19 = scalar_lea.sflag [#allocation5], %s1094_s8  ;;  %s1125_s30 = int_to_ptr.vmem [resolvable:$true] %s472_s30 }
  0x6e   : > { %630 = vmatprep.subr.bf16.mxu0 %v629_v8  ;;  %s807_s27 = scalar_lea.vmem %s1125_s30, 256  ;;  %p1189_p0 = scmp.ne.s32.totalorder %s1184_s13, 0 }
  0x6f   : > { %634 = vmatprep.subr.bf16.mxu1 %v633_v11  ;;  %p808_p11 = scmp.ne.s32.totalorder %s1125_s30, %s807_s27  ;;  %s885_s20 = smov [#allocation9]  }
  0x70   : > { %636 = vmatpush3.bf16.msra.mxu1 %v633_v11  ;;  %s811_s29 = sshll.u32 %s885_s20, 4  ;;  %s812_s29 = int_to_ptr.vmem [resolvable:$false] %s811_s29 }
  0x71   : > { %632 = vmatpush3.bf16.msra.mxu0 %v629_v8  ;;  %638 = vmatprep.subr.bf16.mxu1 %v637_v24  ;;  %p809_p2 = pnand %p808_p11, %p1189_p0  ;;  %s813_s5 = scalar_lea.vmem %s812_s29, 512 }
  0x72   : > { %p814_p7 = scmp.lt.s32.totalorder %s1125_s30, %s812_s29  ;;  %p815_p9 = scmp.lt.s32.totalorder %s813_s5, %s807_s27 }
  0x73   : > { %v253_v12 = vld [vmem:[#allocation2] sm:$0xff]  ;;  %v254_v16 = vld [vmem:[#allocation2 + $0x8] sm:$0xff]  ;;  %p810_p3 = pneg %p809_p2 }
  0x74   : > { %v255_v13 = vld [vmem:[#allocation2 + $0x1] sm:$0xff]  ;;  %v256_v17 = vld [vmem:[#allocation2 + $0x9] sm:$0xff]  ;;  %640 = vmatpush3.bf16.msra.mxu1 %v637_v24  ;;  %p816_p12 = por %p815_p9, %p814_p7 }
  0x75   : > { %v259_v14 = vld [vmem:[#allocation2 + $0x2] sm:$0xff]  ;;  %v257_v15 = vadd.f32 %v255_v13, %v253_v12  ;;  %v260_v18 = vld [vmem:[#allocation2 + $0xa] sm:$0xff]  ;;  %v258_v19 = vadd.f32 %v256_v17, %v254_v16 }
  0x76   : > { %p817_p1 = pnand %p816_p12, %p810_p3 }
  0x77   : > { %v261_v20 = vadd.f32 %v259_v14, %v257_v15  ;;  %v262_v21 = vadd.f32 %v260_v18, %v258_v19 }
  0x79   : > { %611 = vmatprep.mubr.msk.f32.mxu0 %vm250_vm1, %v261_v20 }
  0x7a   : > { %612 = vmatmul.mubr.msk.f32.vlgmr.msra.gmra.mrb[0].mxu0 %vm250_vm1, %v262_v21 }
 0x14d   : > { %v613_v26 = vpop.f32.mrb[0].mxu0 }
 0x14e   : > { %v356_v27 = vadd.f32 %v613_v26, %v577_v25  ;;  %v350_v28 = vpop.f32.mrb[1].mxu0 }
 0x14f   : > { %v351_v29 = vadd.f32 %v577_v25, %v350_v28 }
 0x150   : > { %v360_v31 = vmax.f32 %v356_v27, 0.0 }
 0x151   : > { %v359_v30 = vmax.f32 %v351_v29, 0.0 }
 0x153   : > { %622 = vmatprep.mubr.msk.f32.mxu1 %vm250_vm1, %v359_v30 }
 0x154   : > { %623 = vmatmul.mubr.msk.f32.vlgmr.msra.gmra.mrb[0].mxu1 %vm250_vm1, %v360_v31 }
 0x227   : > { %v624_v32 = vpop.f32.mrb[0].mxu1 }
 0x228   : > { %v439_v33 = vadd.f32 %v624_v32, %v577_v25  ;;  %v433_v34 = vpop.f32.mrb[1].mxu1 }
 0x229   : > { %v434_v35 = vadd.f32 %v577_v25, %v433_v34 }
 0x22a   : > { %v583_v36 = vmul.f32 -1.442695, %v439_v33 }
 0x22b   : > { %v582_v37 = vmul.f32 -1.442695, %v434_v35 }
 0x22c   : > { %713 = vpow2.f32 %v583_v36 }
 0x22d   : > { %715 = vpow2.f32 %v582_v37 }
 0x236   : > { %v714_v38 = vpop.eup %713 }
 0x237   : > { %v716_v39 = vpop.eup %715  ;;  %v449_v40 = vadd.f32 1.0, %v714_v38 }
 0x238   : > { %v448_v41 = vadd.f32 1.0, %v716_v39 }
 0x239   : > { %717 = vrcp.f32 %v449_v40 }
 0x23a   : > { %719 = vrcp.f32 %v448_v41 }
 0x243   : > { %v718_v42 = vpop.eup %717 }
 0x244   : > { %v720_v43 = vpop.eup %719  ;;  %v455_v44 = vmul.f32 %v718_v42, %v249_v7 }
 0x245   : > { %v454_v45 = vmul.f32 %v720_v43, %v248_v6 }
 0x246   : > { %457 = vst.msk [vmem:[%s244_s12 + $0x8] sm:$0xff] %vm250_vm1, %v455_v44 }
 0x247   : > { %456 = vst.msk [vmem:[%s244_s12] sm:$0xff] %vm250_vm1, %v454_v45 }
 0x248   : > { %820 = shalt.err (!%p817_p1)
}
 0x249   : > { %s821_s9 = scalar_lea.hbm %s1123_s28, 256  ;;  %s825_s25 = scalar_lea.hbm %s1175_s4, 512 }
 0x24a   : > { %p822_p13 = scmp.ne.s32.totalorder %s1123_s28, %s821_s9  ;;  %p826_p4 = scmp.lt.u32.totalorder %s1123_s28, %s1175_s4 }
 0x24b   : > { %p827_p5 = scmp.lt.u32.totalorder %s825_s25, %s821_s9  ;;  %p829_p11 = scmp.lt.u32.totalorder %s821_s9, %s1123_s28 }
 0x24c   : > { %p823_p6 = pnand %p822_p13, %p1189_p0 }
 0x24d   : > { %p828_p8 = por %p827_p5, %p826_p4 }
 0x24e   : > { %p824_p10 = pneg %p823_p6 }
 0x24f   : > { %p830_p2 = por %p829_p11, %p828_p8 }
 0x251   : > { %p831_p3 = pnand %p830_p2, %p824_p10 }
 0x253   : > { %834 = shalt.err (!%p831_p3)
}
 0x254   : > { %s886_s11 = smov 128   ;;  %s887_s12 = smov 8  }
 0x255   : > { %651 = dma.vmem_to_hbm [thread:$0]  (%p1189_p0), %s1125_s30, 256, %s1123_s28, %s459_s19, %s886_s11, %s886_s11, %s887_s12  }
 0x256 PF: > { %s487_s6 = sand.u32 1, %s865_s15   ;;  %p1190_p7 = scmp.ne.s32.totalorder %s1180_s22, 0 }
 0x257   : > { %p1191_p9 = scmp.ge.s32.totalorder %s877_s18, 2  ;;  %s488_s7 = scalar_lea.sflag [#allocation5], %s487_s6 }
 0x259   : > { %p665_p12 = pnand %p1191_p9, %p1190_p7 }
 0x25b   : > { %860 = dma.done.wait (!%p665_p12), %s488_s7, 256  }
 0x25c   : > { %862 = vsyncadd (!%p665_p12), %s488_s7, 4294967040  ;;  %p18_p1 = scmp.ge.s32.totalorder %s1029_s26, 4   ;;  %s1192_s15 = smov %s869_s16 }
 0x25d   : > { %s1193_s16 = smov %s873_s17  ;;  %s1194_s17 = smov %s1045_s14 }
 0x25e   : > { %s1195_s18 = smov %s1029_s26  ;;  %20 = sbr.rel (!%p18_p1) target bundleno = 6 (0x6), region = 89 }
 0x265   :  { %493 = vsyncpa [#allocation4], 1 }
 0x266   :  { %495 = vsyncpa [#allocation4 + $0x1], 1 }
 0x267   :  { %496 = vsyncpa [#allocation7], 1 }
 0x268   :  { %497 = vsyncpa [#allocation5], 1 }
 0x269   :  { %499 = vsyncpa [#allocation5 + $0x1], 1 }

</bundles_post_ra>
